<compile_context>
chip_gen: v5e
topology: v5e:2x2
jax: 0.10.0
libtpu: 0.0.40
codegen_flags: <defaults>
</compile_context>

<pallas_src>
import functools

import jax
import jax.numpy as jnp
from jax.experimental import pallas as pl
from jax.experimental.pallas import tpu as pltpu


def _round_up(a, m):
    return (a + m - 1) // m * m


def _series_decomp_kernel(x_ref, res_ref, mean_ref, *,
                          kernel_size, pad_front, pad_end, seq_len, channels):
    """One (rows, L*C) tile.  rows = batch rows, lanes = flattened (L, C).

    The flat index of (l, c) is l*C + c, so a window shift of j time steps is
    a lane shift of j*C.  Replicate padding adds pad_front copies of the first
    C lanes and pad_end copies of the last C lanes.
    """
    k, L, C = kernel_size, seq_len, channels
    W = L * C
    rows = x_ref.shape[0]
    f32 = jnp.float32

    x = x_ref[...].astype(f32)                       # (rows, W), lane-dense

    # Replicate-pad in-value (no scratch, never touches HBM).
    pieces = []
    if pad_front:
        pieces += [x[:, 0:C]] * pad_front
    pieces.append(x)
    if pad_end:
        pieces += [x[:, W - C:W]] * pad_end
    xpad = jnp.concatenate(pieces, axis=-1) if len(pieces) > 1 else x
    Wp = W + (pad_front + pad_end) * C
    Lp = L + pad_front + pad_end

    if k >= 16:
        # Cumsum-difference moving average (O(log Lp) shift+adds): strided
        # Hillis-Steele prefix sum along the L axis (stride C in flat lanes).
        # Note: f32 prefix sums can lose precision for very long / large-
        # magnitude series; the direct path below is kept for small k.
        s = xpad
        shift = 1
        while shift < Lp:
            z = jnp.zeros((rows, shift * C), f32)
            s = s + jnp.concatenate([z, s[:, : Wp - shift * C]], axis=-1)
            shift *= 2
        # window_sum[l*C+c] = prefix[(l+k-1)*C+c] - prefix[(l-1)*C+c]
        prev = jnp.concatenate(
            [jnp.zeros((rows, C), f32), s[:, : W - C]], axis=-1)
        wsum = s[:, (k - 1) * C:(k - 1) * C + W] - prev
    else:
        # Direct windowed sum with up to 4 independent partial accumulators
        # (breaks the serial add chain, bounded number of live full-tile temps).
        n_acc = min(4, k)
        accs = [xpad[:, j * C: j * C + W] for j in range(n_acc)]
        for j in range(n_acc, k):
            accs[j % n_acc] = accs[j % n_acc] + xpad[:, j * C: j * C + W]
        wsum = accs[0]
        for a in accs[1:]:
            wsum = wsum + a

    mean = wsum * (1.0 / k)
    mean_ref[...] = mean.astype(mean_ref.dtype)
    res_ref[...] = (x - mean).astype(res_ref.dtype)


def _choose_rows(n_rows, width, dtype):
    """Pick (rows_per_block, padded_row_count) for (rows, width) blocks."""
    itemsize = jnp.dtype(dtype).itemsize
    sub = {4: 8, 2: 16, 1: 32}.get(itemsize, 8)      # sublane packing
    budget = 2 << 20                                  # ~2 MiB f32 working tile

    if n_rows % sub != 0:
        if n_rows * width * 4 <= 2 * budget:
            # Single full-row block (block dims == array dims is always legal);
            # avoids an HBM padding copy for the common small-batch case.
            return n_rows, n_rows
        n_pad = _round_up(n_rows, sub)                # rare fallback: pad rows
    else:
        n_pad = n_rows

    max_rows = max(sub, (budget // max(width * 4, 1)) // sub * sub)

    # Largest divisor of n_pad that is a multiple of sub and within budget.
    best, bb = sub, sub
    while bb <= min(max_rows, n_pad):
        if n_pad % bb == 0:
            best = bb
        bb += sub

    # Prefer >= 2 grid steps so both v7x TensorCores get work on the
    # "parallel" row axis.
    if best == n_pad and n_pad > sub:
        best, bb = sub, sub
        while bb < n_pad:
            if n_pad % bb == 0:
                best = bb
            bb += sub
    return best, n_pad


def series_decomp(x, kernel_size):
    """Pallas implementation of SeriesDecomp.forward.

    x: (B, L, C).  Returns (res, moving_mean), both (B, L, C), same dtype as x.
    """
    B, L, C = x.shape
    k = kernel_size

    # Replicate-padding amounts, matching MovingAvg.forward.
    if k % 2 == 1:
        pad_front = pad_end = (k - 1) // 2
    else:
        pad_front, pad_end = k // 2, 0
    # Pooled length must equal L for res = x - mean (same constraint as the
    # PyTorch module, which would raise a shape error otherwise).
    if L + pad_front + pad_end - k + 1 != L:
        raise ValueError(
            "SeriesDecomp needs an odd kernel_size (or kernel_size == 2); got "
            f"kernel_size={k} with seq_len={L}.")

    W = L * C
    # Free reshape (collapses contiguous trailing dims) — no transpose, no copy.
    xf = x.reshape(B, W)

    rows_block, R = _choose_rows(B, W, x.dtype)
    if R > B:
        xf = jnp.pad(xf, ((0, R - B), (0, 0)))       # rare fallback only

    grid = (R // rows_block,)
    spec = pl.BlockSpec((rows_block, W), lambda r: (r, 0))

    kernel = functools.partial(
        _series_decomp_kernel,
        kernel_size=k, pad_front=pad_front, pad_end=pad_end,
        seq_len=L, channels=C)

    res_f, mean_f = pl.pallas_call(
        kernel,
        out_shape=(
            jax.ShapeDtypeStruct((R, W), x.dtype),
            jax.ShapeDtypeStruct((R, W), x.dtype),
        ),
        grid_spec=pltpu.PrefetchScalarGridSpec(
            num_scalar_prefetch=0,
            grid=grid,
            in_specs=[spec],
            out_specs=(spec, spec),
        ),
        compiler_params=pltpu.CompilerParams(
            dimension_semantics=("parallel",),
            # ~2 MiB f32 tiles: double-buffered I/O + in-kernel f32 temporaries
            # stay around ~32 MiB, safe on v7x's 64 MiB physical VMEM while
            # raising v5e's 16 MiB default scoped limit.
            vmem_limit_bytes=48 * 1024 * 1024,
        ),
    )(xf)

    if R > B:
        res_f, mean_f = res_f[:B], mean_f[:B]

    # TODO(synk): for very large L*C per row (e.g. L~720 with d_model-sized C)
    # block the L axis with a (k-1)-sample halo to keep per-block VMEM bounded.
    return res_f.reshape(B, L, C), mean_f.reshape(B, L, C)


def _series_decomp_ref(x, kernel_size):
    """Pure-JAX reference mirroring the PyTorch code path (odd k, or k == 2)."""
    k = kernel_size
    if k % 2 == 1:
        pf = pe = (k - 1) // 2
    else:
        pf, pe = k // 2, 0
    pieces = []
    if pf:
        pieces.append(jnp.repeat(x[:, 0:1, :], pf, axis=1))
    pieces.append(x)
    if pe:
        pieces.append(jnp.repeat(x[:, -1:, :], pe, axis=1))
    xpad = jnp.concatenate(pieces, axis=1).astype(jnp.float32)
    L = x.shape[1]
    windows = jnp.stack([xpad[:, j:j + L, :] for j in range(k)], axis=0)
    mean = jnp.mean(windows, axis=0).astype(x.dtype)
    return x - mean, mean


def _check(x, kernel_size):
    res, mean = series_decomp(x, kernel_size)
    res, mean = jax.block_until_ready(res), jax.block_until_ready(mean)
    res_ref, mean_ref = _series_decomp_ref(x, kernel_size)
    assert jnp.allclose(mean, mean_ref, atol=1e-4, rtol=1e-4)
    assert jnp.allclose(res, res_ref, atol=1e-4, rtol=1e-4)
    assert jnp.allclose(res + mean, x, atol=1e-4, rtol=1e-4)


if __name__ == "__main__":
    key = jax.random.PRNGKey(0)
    k1, k2, k3 = jax.random.split(key, 3)

    # Main case: small shapes, odd kernel (direct-sum path).
    x1 = jax.random.normal(k1, (2, 16, 8), dtype=jnp.float32)
    _check(x1, 5)

    # Large kernel: exercises the cumsum-difference path (k >= 16).
    x2 = jax.random.normal(k2, (8, 64, 4), dtype=jnp.float32)
    _check(x2, 25)

    # Even kernel_size == 2 (front-only padding branch).
    x3 = jax.random.normal(k3, (2, 16, 8), dtype=jnp.float32)
    _check(x3, 2)

    print("KERNEL_OK")
</pallas_src>

<mosaic_0001>
module attributes {stable_mosaic.version = 11 : i64} {
  func.func @_series_decomp_kernel(%arg0: i32, %arg1: memref<2x128xf32, #tpu.memory_space<vmem>>, %arg2: memref<2x128xf32, #tpu.memory_space<vmem>>, %arg3: memref<2x128xf32, #tpu.memory_space<vmem>>) attributes {dimension_semantics = [#tpu.dimension_semantics<parallel>], iteration_bounds = array<i64: 1>, scalar_prefetch = 0 : i64, scratch_operands = 0 : i64, tpu.core_type = #tpu.core_type<tc>, window_params = [{transform_indices = @transform_0, window_bounds = array<i64: 2, 128>}, {transform_indices = @transform_1, window_bounds = array<i64: 2, 128>}, {transform_indices = @transform_2, window_bounds = array<i64: 2, 128>}]} {
    %c0 = arith.constant 0 : index
    %c0_0 = arith.constant 0 : index
    %0 = vector.load %arg1[%c0, %c0_0] : memref<2x128xf32, #tpu.memory_space<vmem>>, vector<2x128xf32>
    %1 = vector.extract_strided_slice %0 {offsets = [0, 0], sizes = [2, 8], strides = [1, 1]} : vector<2x128xf32> to vector<2x8xf32>
    %2 = vector.extract_strided_slice %0 {offsets = [0, 120], sizes = [2, 8], strides = [1, 1]} : vector<2x128xf32> to vector<2x8xf32>
    %3 = tpu.concatenate %1, %1, %0, %2, %2 in 1 : vector<2x8xf32>, vector<2x8xf32>, vector<2x128xf32>, vector<2x8xf32>, vector<2x8xf32> -> vector<2x160xf32>
    %4 = vector.extract_strided_slice %3 {offsets = [0, 0], sizes = [2, 128], strides = [1, 1]} : vector<2x160xf32> to vector<2x128xf32>
    %5 = vector.extract_strided_slice %3 {offsets = [0, 8], sizes = [2, 128], strides = [1, 1]} : vector<2x160xf32> to vector<2x128xf32>
    %6 = vector.extract_strided_slice %3 {offsets = [0, 16], sizes = [2, 128], strides = [1, 1]} : vector<2x160xf32> to vector<2x128xf32>
    %7 = vector.extract_strided_slice %3 {offsets = [0, 24], sizes = [2, 128], strides = [1, 1]} : vector<2x160xf32> to vector<2x128xf32>
    %8 = vector.extract_strided_slice %3 {offsets = [0, 32], sizes = [2, 128], strides = [1, 1]} : vector<2x160xf32> to vector<2x128xf32>
    %9 = arith.addf %4, %8 : vector<2x128xf32>
    %10 = arith.addf %9, %5 : vector<2x128xf32>
    %11 = arith.addf %10, %6 : vector<2x128xf32>
    %12 = arith.addf %11, %7 : vector<2x128xf32>
    %cst = arith.constant 2.000000e-01 : f32
    %13 = vector.broadcast %cst : f32 to vector<2x128xf32>
    %14 = arith.mulf %12, %13 : vector<2x128xf32>
    %c0_1 = arith.constant 0 : index
    %c0_2 = arith.constant 0 : index
    %15 = vector.load %arg3[%c0_1, %c0_2] : memref<2x128xf32, #tpu.memory_space<vmem>>, vector<2x128xf32>
    tpu.vector_store %arg3[%c0_1, %c0_2], %14 {strides = array<i32>} : memref<2x128xf32, #tpu.memory_space<vmem>>, vector<2x128xf32>,
    %16 = arith.subf %0, %14 : vector<2x128xf32>
    %c0_3 = arith.constant 0 : index
    %c0_4 = arith.constant 0 : index
    %17 = vector.load %arg2[%c0_3, %c0_4] : memref<2x128xf32, #tpu.memory_space<vmem>>, vector<2x128xf32>
    tpu.vector_store %arg2[%c0_3, %c0_4], %16 {strides = array<i32>} : memref<2x128xf32, #tpu.memory_space<vmem>>, vector<2x128xf32>,
    return
  }
  func.func @transform_0(%arg0: i32) -> (i32, i32) {
    %c0_i32 = arith.constant 0 : i32
    %c0_i32_0 = arith.constant 0 : i32
    return %arg0, %c0_i32 : i32, i32
  }
  func.func @transform_1(%arg0: i32) -> (i32, i32) {
    %c0_i32 = arith.constant 0 : i32
    %c0_i32_0 = arith.constant 0 : i32
    return %arg0, %c0_i32 : i32, i32
  }
  func.func @transform_2(%arg0: i32) -> (i32, i32) {
    %c0_i32 = arith.constant 0 : i32
    %c0_i32_0 = arith.constant 0 : i32
    return %arg0, %c0_i32 : i32, i32
  }
}

</mosaic_0001>

<bundles_post_ra>
// kernel: tpu_custom_call.1
= control target key start
LH: loop header
LB: loop body
LE: loop exit
PB: predicated region body
PF: predicated region fallthrough
CT: control target
= control target key end

     0   :  { %8 = vsyncpa [#allocation3], 0  ;;  %s250_s0 = inlined_call_operand.hbm [shape: f32[2,128], index: 0, kind: input, shape index: {}]   ;;  %s251_s1 = inlined_call_operand.hbm [shape: f32[2,128], index: 1, kind: output, shape index: {0}]   ;;  %s252_s2 = inlined_call_operand.hbm [shape: f32[2,128], index: 2, kind: output, shape index: {1}]  }
   0x1   :  { %9 = vsyncpa [#allocation4], 0 }
   0x2   :  { %10 = vsyncpa [#allocation7], 0  ;;  %s16_s11 = sshll.u32 %s250_s0, 4  ;;  %s207_s12 = smov [#allocation2]   ;;  %s17_s11 = int_to_ptr.hbm [resolvable:$true] %s16_s11 }
   0x3   :  { %s18_s13 = sshll.u32 %s207_s12, 4  ;;  %s19_s13 = int_to_ptr.vmem [resolvable:$true] %s18_s13 }
   0x4   :  { %21 = dma.hbm_to_vmem [thread:$0]  %s17_s11, 32, %s19_s13, [#allocation3]  }
   0x5   :  { %201 = dma.done.wait [#allocation3], 32  }
   0x6   :  { %202 = vsyncadd [#allocation3], 4294967264  ;;  %v236_v0 = vld [vmem:[#allocation2] sm:$0x3]  ;;  %s208_s14 = smov 8   ;;  %s209_s15 = smov 24  }
   0x7   :  { %28 = vrot.lane.b32.xlu0 %v236_v0, %s208_s14  ;;  %34 = vrot.lane.b32.xlu1 %v236_v0, %s209_s15  ;;  %s210_s16 = smov 16   ;;  %s211_s17 = smov 32   ;;  %vm40_vm0 = vcmask 64512   ;;  %vm42_vm1 = vcmask 130048   ;;  %vm45_vm2 = vcmask 195584   ;;  %vm53_vm3 = vcmask 785408  }
   0x8   :  { %s212_s0 = smov 120   ;;  %s213_s18 = smov 96   ;;  %vm61_vm4 = vcmask 982016   ;;  %vm69_vm5 = vcmask 916480   ;;  %vm77_vm6 = vcmask 850944  }
   0x9   :  { %s214_s19 = smov 112   ;;  %s215_s20 = smov 104  }
   0xa   :  { %s216_s21 = smov [#allocation6]   ;;  %s103_s25 = sshll.u32 %s252_s2, 4  ;;  %s104_s25 = int_to_ptr.hbm [resolvable:$true] %s103_s25 }
   0xb   :  { %s101_s22 = sshll.u32 %s216_s21, 4  ;;  %s217_s26 = smov [#allocation5]   ;;  %s102_s22 = int_to_ptr.vmem [resolvable:$true] %s101_s22 }
   0xc   :  { %s90_s27 = sshll.u32 %s217_s26, 4  ;;  %s92_s30 = sshll.u32 %s251_s1, 4  ;;  %s91_s27 = int_to_ptr.vmem [resolvable:$true] %s90_s27  ;;  %s93_s30 = int_to_ptr.hbm [resolvable:$true] %s92_s30 }
   0xf   :  { %31 = vrot.lane.b32.xlu0 %v236_v0, %s210_s16  ;;  %37 = vrot.lane.b32.xlu1 %v236_v0, %s211_s17 }
  0x79   :  { %v29_v1 = vpop.permute.xlu0 %28  ;;  %v35_v2 = vpop.permute.xlu1 %34 }
  0x7a   :  { %v41_v3 = vsel %vm40_vm0, %v236_v0, %v29_v1 }
  0x81   :  { %v32_v4 = vpop.permute.xlu0 %31  ;;  %v38_v5 = vpop.permute.xlu1 %37 }
  0x82   :  { %v43_v6 = vsel %vm42_vm1, %v41_v3, %v32_v4  ;;  %v44_v7 = vsel %vm42_vm1, %v32_v4, %v35_v2 }
  0x83   :  { %v46_v8 = vsel %vm45_vm2, %v44_v7, %v38_v5  ;;  %57 = vrot.lane.b32.xlu0 %v43_v6, %s212_s0  ;;  %49 = vrot.lane.b32.xlu2 %v43_v6, %s213_s18 }
  0x84   :  { %59 = vrot.lane.b32.xlu1 %v46_v8, %s212_s0 }
  0x8b   :  { %67 = vrot.lane.b32.xlu0 %v46_v8, %s214_s19  ;;  %51 = vrot.lane.b32.xlu2 %v46_v8, %s213_s18 }
  0x8c   :  { %73 = vrot.lane.b32.xlu1 %v43_v6, %s215_s20 }
  0x93   :  { %65 = vrot.lane.b32.xlu2 %v43_v6, %s214_s19 }
  0x9b   :  { %75 = vrot.lane.b32.xlu2 %v46_v8, %s215_s20 }
  0xdd   :  { %v50_v9 = vpop.permute.xlu2 %49 }
  0xe5   :  { %v52_v10 = vpop.permute.xlu2 %51 }
  0xe6   :  { %v54_v14 = vsel %vm53_vm3, %v50_v9, %v52_v10 }
  0xe7   :  { %v56_v16 = vadd.f32 %v54_v14, %v43_v6 }
  0xed   :  { %v66_v11 = vpop.permute.xlu2 %65 }
  0xf5   :  { %v58_v12 = vpop.permute.xlu0 %57  ;;  %v76_v19 = vpop.permute.xlu2 %75 }
  0xf6   :  { %v60_v13 = vpop.permute.xlu1 %59 }
  0xf7   :  { %v62_v15 = vsel %vm61_vm4, %v58_v12, %v60_v13 }
  0xf8   :  { %v64_v17 = vadd.f32 %v62_v15, %v56_v16 }
  0xfd   :  { %v68_v18 = vpop.permute.xlu0 %67 }
  0xfe   :  { %v70_v20 = vsel %vm69_vm5, %v66_v11, %v68_v18  ;;  %v74_v21 = vpop.permute.xlu1 %73 }
  0xff   :  { %v72_v22 = vadd.f32 %v70_v20, %v64_v17  ;;  %v78_v23 = vsel %vm77_vm6, %v74_v21, %v76_v19 }
 0x101   :  { %v80_v24 = vadd.f32 %v78_v23, %v72_v22 }
 0x103   :  { %v81_v25 = vmul.f32 0.2, %v80_v24 }
 0x105   :  { %v83_v26 = vsub.f32 %v236_v0, %v81_v25  ;;  %82 = vst [vmem:[#allocation6] sm:$0x3] %v81_v25 }
 0x106   :  { %106 = dma.vmem_to_hbm [thread:$0]  %s102_s22, 32, %s104_s25, [#allocation7]  }
 0x107   :  { %84 = vst [vmem:[#allocation5] sm:$0x3] %v83_v26 }
 0x108   :  { %95 = dma.vmem_to_hbm [thread:$0]  %s91_s27, 32, %s93_s30, [#allocation4]  }
 0x109   :  { %203 = dma.done.wait [#allocation4], 32  }
 0x10a   :  { %204 = vsyncadd [#allocation4], 4294967264 }
 0x10b   :  { %205 = dma.done.wait [#allocation7], 32  }
 0x10c   :  { %206 = vsyncadd [#allocation7], 4294967264 }
 0x10d   :  { %115 = vsyncpa [#allocation3], 1 }
 0x10e   :  { %116 = vsyncpa [#allocation4], 1 }
 0x10f   :  { %117 = vsyncpa [#allocation7], 1 }

</bundles_post_ra>
